<compile_context>
chip_gen: v7x
topology: tpu7x:2x2x1
jax: 0.10.0
libtpu: 0.0.40
codegen_flags: <defaults>
</compile_context>

<pallas_src>
import math
from functools import partial

import jax
import jax.numpy as jnp
from jax.experimental import pallas as pl
from jax.experimental.pallas import tpu as pltpu

TEXT_DIM = 512
IMAGE_DIM = 768
SHARED_DIM = 128
PRIME_DIM = 16
BN_EPS = 1e-5


# ----------------------------------------------------------------------------
# Kernel: two first-layer matmuls (text / image), lane-aligned concat,
# one fused second matmul, folded-BN bias + ReLU epilogue in f32.
# ----------------------------------------------------------------------------
def unimodal_kernel(xt_ref, xi_ref, w1t_ref, w1i_ref, b1_ref, w2_ref, b2_ref,
                    out_ref, *, compute_dtype):
    xt = xt_ref[...].astype(compute_dtype)                            # (TB, 512)
    xi = xi_ref[...].astype(compute_dtype)                            # (TB, 768)
    ht = jnp.dot(xt, w1t_ref[...], preferred_element_type=jnp.float32)  # (TB,128)
    hi = jnp.dot(xi, w1i_ref[...], preferred_element_type=jnp.float32)  # (TB,128)
    h = jnp.concatenate([ht, hi], axis=1) + b1_ref[...]               # (TB, 256), f32
    h = jnp.maximum(h, 0.0)                                           # ReLU (post BN-fold)
    y = jnp.dot(h.astype(compute_dtype), w2_ref[...],
                preferred_element_type=jnp.float32) + b2_ref[...]     # (TB, 32)
    out_ref[...] = jnp.maximum(y, 0.0)


# ----------------------------------------------------------------------------
# Parameter construction (mimics nn.Linear / BatchNorm1d defaults, but with
# non-trivial BN running stats so the fold is actually exercised).
# ----------------------------------------------------------------------------
def _linear_init(key, fan_in, fan_out):
    kw, kb = jax.random.split(key)
    bound = 1.0 / math.sqrt(fan_in)
    w = jax.random.uniform(kw, (fan_in, fan_out), jnp.float32, -bound, bound)
    b = jax.random.uniform(kb, (1, fan_out), jnp.float32, -bound, bound)
    return w, b


def _bn_init(key, n):
    kg, kb, km, kv = jax.random.split(key, 4)
    gamma = jax.random.uniform(kg, (n,), jnp.float32, 0.5, 1.5)
    beta = jax.random.uniform(kb, (n,), jnp.float32, -0.5, 0.5)
    mean = 0.1 * jax.random.normal(km, (n,), jnp.float32)
    var = jax.random.uniform(kv, (n,), jnp.float32, 0.5, 2.0)
    return gamma, beta, mean, var


def init_params(key):
    ks = jax.random.split(key, 8)
    p = {}
    # text branch
    p["w1t"], p["b1t"] = _linear_init(ks[0], TEXT_DIM, SHARED_DIM)
    p["bn1t"] = _bn_init(ks[1], SHARED_DIM)
    p["w2t"], p["b2t"] = _linear_init(ks[2], SHARED_DIM, PRIME_DIM)
    p["bn2t"] = _bn_init(ks[3], PRIME_DIM)
    # image branch
    p["w1i"], p["b1i"] = _linear_init(ks[4], IMAGE_DIM, SHARED_DIM)
    p["bn1i"] = _bn_init(ks[5], SHARED_DIM)
    p["w2i"], p["b2i"] = _linear_init(ks[6], SHARED_DIM, PRIME_DIM)
    p["bn2i"] = _bn_init(ks[7], PRIME_DIM)
    return p


def _fold_bn(w, b, bn):
    # inference-mode BatchNorm1d folded into the preceding Linear
    gamma, beta, mean, var = bn
    scale = gamma / jnp.sqrt(var + BN_EPS)
    shift = beta - mean * scale
    return w * scale[None, :], b * scale[None, :] + shift[None, :]


def fuse_params(params, compute_dtype=jnp.bfloat16):
    """Fold BN into the Linears, assemble kernel operands. Call ONCE, reuse."""
    w1t, b1t = _fold_bn(params["w1t"], params["b1t"], params["bn1t"])
    w2t, b2t = _fold_bn(params["w2t"], params["b2t"], params["bn2t"])
    w1i, b1i = _fold_bn(params["w1i"], params["b1i"], params["bn1i"])
    w2i, b2i = _fold_bn(params["w2i"], params["b2i"], params["bn2i"])

    # Second layer stays fused as a tiny block-diagonal (256, 32) weight.
    w2 = jnp.zeros((2 * SHARED_DIM, 2 * PRIME_DIM), jnp.float32)
    w2 = w2.at[:SHARED_DIM, :PRIME_DIM].set(w2t)
    w2 = w2.at[SHARED_DIM:, PRIME_DIM:].set(w2i)

    return {
        "w1t": w1t.astype(compute_dtype),                  # (512, 128)
        "w1i": w1i.astype(compute_dtype),                  # (768, 128)
        "b1": jnp.concatenate([b1t, b1i], axis=1),         # (1, 256) f32
        "w2": w2.astype(compute_dtype),                    # (256, 32)
        "b2": jnp.concatenate([b2t, b2i], axis=1),         # (1, 32)  f32
    }


# ----------------------------------------------------------------------------
# Wrapper
# ----------------------------------------------------------------------------
def _default_batch_tile(B):
    if B % 8 != 0:
        return B                               # single full-extent block (valid BlockSpec)
    # Aim for >=2 grid steps when possible (v7x has 2 TensorCores), cap at 512 rows.
    half = ((B // 2 + 7) // 8) * 8
    return max(8, min(512, half, B))


def unimodal_detection(text_encoding, image_encoding, fused, *, batch_tile=None):
    B = text_encoding.shape[0]
    tb = batch_tile if batch_tile is not None else _default_batch_tile(B)
    grid = (pl.cdiv(B, tb),)
    compute_dtype = fused["w1t"].dtype

    out = pl.pallas_call(
        partial(unimodal_kernel, compute_dtype=compute_dtype),
        out_shape=jax.ShapeDtypeStruct((B, 2 * PRIME_DIM), jnp.float32),
        grid=grid,
        in_specs=[
            pl.BlockSpec((tb, TEXT_DIM), lambda i: (i, 0)),    # text acts: batch-tiled
            pl.BlockSpec((tb, IMAGE_DIM), lambda i: (i, 0)),   # image acts: batch-tiled
            pl.BlockSpec(fused["w1t"].shape, lambda i: (0, 0)),  # weights: resident
            pl.BlockSpec(fused["w1i"].shape, lambda i: (0, 0)),
            pl.BlockSpec(fused["b1"].shape, lambda i: (0, 0)),
            pl.BlockSpec(fused["w2"].shape, lambda i: (0, 0)),
            pl.BlockSpec(fused["b2"].shape, lambda i: (0, 0)),
        ],
        out_specs=pl.BlockSpec((tb, 2 * PRIME_DIM), lambda i: (i, 0)),
        compiler_params=pltpu.CompilerParams(dimension_semantics=("parallel",)),
    )(text_encoding, image_encoding,
      fused["w1t"], fused["w1i"], fused["b1"], fused["w2"], fused["b2"])

    return out[:, :PRIME_DIM], out[:, PRIME_DIM:]


# ----------------------------------------------------------------------------
# References for correctness checking
# ----------------------------------------------------------------------------
def _reference_f32(text_encoding, image_encoding, params):
    """Un-fused, full f32, explicit BN — matches the PyTorch module in eval mode."""
    def bn(y, p):
        gamma, beta, mean, var = p
        return (y - mean) / jnp.sqrt(var + BN_EPS) * gamma + beta

    def branch(x, w1, b1, bn1, w2, b2, bn2):
        h = jnp.maximum(bn(x @ w1 + b1, bn1), 0.0)
        return jnp.maximum(bn(h @ w2 + b2, bn2), 0.0)

    tp = branch(text_encoding, params["w1t"], params["b1t"], params["bn1t"],
                params["w2t"], params["b2t"], params["bn2t"])
    ip = branch(image_encoding, params["w1i"], params["b1i"], params["bn1i"],
                params["w2i"], params["b2i"], params["bn2i"])
    return tp, ip


def _reference_matched(text_encoding, image_encoding, fused):
    """Same math as the kernel (same bf16 operand rounding, f32 accumulation)."""
    cdt = fused["w1t"].dtype
    ht = jnp.dot(text_encoding.astype(cdt), fused["w1t"],
                 preferred_element_type=jnp.float32)
    hi = jnp.dot(image_encoding.astype(cdt), fused["w1i"],
                 preferred_element_type=jnp.float32)
    h = jnp.maximum(jnp.concatenate([ht, hi], axis=1) + fused["b1"], 0.0)
    y = jnp.dot(h.astype(cdt), fused["w2"],
                preferred_element_type=jnp.float32) + fused["b2"]
    y = jnp.maximum(y, 0.0)
    return y[:, :PRIME_DIM], y[:, PRIME_DIM:]


if __name__ == "__main__":
    key = jax.random.PRNGKey(0)
    k_params, k_text, k_image = jax.random.split(key, 3)

    B = 8
    params = init_params(k_params)
    text_encoding = jax.random.normal(k_text, (B, TEXT_DIM), jnp.float32)
    image_encoding = jax.random.normal(k_image, (B, IMAGE_DIM), jnp.float32)

    # BN fold + weight assembly done ONCE, outside the per-call path.
    fused = fuse_params(params, compute_dtype=jnp.bfloat16)

    text_prime, image_prime = unimodal_detection(text_encoding, image_encoding, fused)
    (text_prime, image_prime) = jax.block_until_ready((text_prime, image_prime))

    assert text_prime.shape == (B, PRIME_DIM)
    assert image_prime.shape == (B, PRIME_DIM)
    assert bool(jnp.all(jnp.isfinite(text_prime))) and bool(jnp.all(jnp.isfinite(image_prime)))

    # Tight check against a reference with identical bf16 operand rounding.
    m_tp, m_ip = _reference_matched(text_encoding, image_encoding, fused)
    assert bool(jnp.allclose(text_prime, m_tp, atol=1e-3, rtol=1e-3))
    assert bool(jnp.allclose(image_prime, m_ip, atol=1e-3, rtol=1e-3))

    # Loose sanity check against the full-f32 un-fused (PyTorch-semantics) reference.
    f_tp, f_ip = _reference_f32(text_encoding, image_encoding, params)
    assert bool(jnp.allclose(text_prime, f_tp, atol=1e-1, rtol=1e-1))
    assert bool(jnp.allclose(image_prime, f_ip, atol=1e-1, rtol=1e-1))

    print("KERNEL_OK")
</pallas_src>

<mosaic_0001>
module attributes {stable_mosaic.version = 11 : i64} {
  func.func @unimodal_kernel(%arg0: i32, %arg1: memref<8x512xf32, #tpu.memory_space<vmem>>, %arg2: memref<8x768xf32, #tpu.memory_space<vmem>>, %arg3: memref<512x128xbf16, #tpu.memory_space<vmem>>, %arg4: memref<768x128xbf16, #tpu.memory_space<vmem>>, %arg5: memref<1x256xf32, #tpu.memory_space<vmem>>, %arg6: memref<256x32xbf16, #tpu.memory_space<vmem>>, %arg7: memref<1x32xf32, #tpu.memory_space<vmem>>, %arg8: memref<8x32xf32, #tpu.memory_space<vmem>>) attributes {dimension_semantics = [#tpu.dimension_semantics<parallel>], iteration_bounds = array<i64: 1>, scalar_prefetch = 0 : i64, scratch_operands = 0 : i64, tpu.core_type = #tpu.core_type<tc>, window_params = [{transform_indices = @transform_0, window_bounds = array<i64: 8, 512>}, {transform_indices = @transform_1, window_bounds = array<i64: 8, 768>}, {pipeline_mode = #tpu.pipeline_mode<synchronous>, transform_indices = @transform_2, window_bounds = array<i64: 512, 128>}, {pipeline_mode = #tpu.pipeline_mode<synchronous>, transform_indices = @transform_3, window_bounds = array<i64: 768, 128>}, {pipeline_mode = #tpu.pipeline_mode<synchronous>, transform_indices = @transform_4, window_bounds = array<i64: 1, 256>}, {pipeline_mode = #tpu.pipeline_mode<synchronous>, transform_indices = @transform_5, window_bounds = array<i64: 256, 32>}, {pipeline_mode = #tpu.pipeline_mode<synchronous>, transform_indices = @transform_6, window_bounds = array<i64: 1, 32>}, {transform_indices = @transform_7, window_bounds = array<i64: 8, 32>}]} {
    %c0 = arith.constant 0 : index
    %c0_0 = arith.constant 0 : index
    %0 = vector.load %arg1[%c0, %c0_0] : memref<8x512xf32, #tpu.memory_space<vmem>>, vector<8x512xf32>
    %1 = arith.truncf %0 : vector<8x512xf32> to vector<8x512xbf16>
    %c0_1 = arith.constant 0 : index
    %c0_2 = arith.constant 0 : index
    %2 = vector.load %arg2[%c0_1, %c0_2] : memref<8x768xf32, #tpu.memory_space<vmem>>, vector<8x768xf32>
    %3 = arith.truncf %2 : vector<8x768xf32> to vector<8x768xbf16>
    %c0_3 = arith.constant 0 : index
    %c0_4 = arith.constant 0 : index
    %4 = vector.load %arg3[%c0_3, %c0_4] : memref<512x128xbf16, #tpu.memory_space<vmem>>, vector<512x128xbf16>
    %cst = arith.constant dense<0.000000e+00> : vector<8x128xf32>
    %5 = tpu.matmul %1, %4, %cst {dimension_numbers = #tpu.dot_dimension_numbers<[1], [0], [0], [1], [0, 0, 1, 1], [], []>} : vector<8x512xbf16>, vector<512x128xbf16>, vector<8x128xf32> -> vector<8x128xf32>
    %c0_5 = arith.constant 0 : index
    %c0_6 = arith.constant 0 : index
    %6 = vector.load %arg4[%c0_5, %c0_6] : memref<768x128xbf16, #tpu.memory_space<vmem>>, vector<768x128xbf16>
    %cst_7 = arith.constant dense<0.000000e+00> : vector<8x128xf32>
    %7 = tpu.matmul %3, %6, %cst_7 {dimension_numbers = #tpu.dot_dimension_numbers<[1], [0], [0], [1], [0, 0, 1, 1], [], []>} : vector<8x768xbf16>, vector<768x128xbf16>, vector<8x128xf32> -> vector<8x128xf32>
    %8 = tpu.concatenate %5, %7 in 1 : vector<8x128xf32>, vector<8x128xf32> -> vector<8x256xf32>
    %c0_8 = arith.constant 0 : index
    %c0_9 = arith.constant 0 : index
    %9 = vector.load %arg5[%c0_8, %c0_9] : memref<1x256xf32, #tpu.memory_space<vmem>>, vector<1x256xf32>
    %10 = vector.broadcast %9 : vector<1x256xf32> to vector<8x256xf32>
    %11 = arith.addf %8, %10 : vector<8x256xf32>
    %cst_10 = arith.constant 0.000000e+00 : f32
    %12 = vector.broadcast %cst_10 : f32 to vector<8x256xf32>
    %13 = arith.maximumf %11, %12 : vector<8x256xf32>
    %14 = arith.truncf %13 : vector<8x256xf32> to vector<8x256xbf16>
    %c0_11 = arith.constant 0 : index
    %c0_12 = arith.constant 0 : index
    %15 = vector.load %arg6[%c0_11, %c0_12] : memref<256x32xbf16, #tpu.memory_space<vmem>>, vector<256x32xbf16>
    %cst_13 = arith.constant dense<0.000000e+00> : vector<8x32xf32>
    %16 = tpu.matmul %14, %15, %cst_13 {dimension_numbers = #tpu.dot_dimension_numbers<[1], [0], [0], [1], [0, 0, 1, 1], [], []>} : vector<8x256xbf16>, vector<256x32xbf16>, vector<8x32xf32> -> vector<8x32xf32>
    %c0_14 = arith.constant 0 : index
    %c0_15 = arith.constant 0 : index
    %17 = vector.load %arg7[%c0_14, %c0_15] : memref<1x32xf32, #tpu.memory_space<vmem>>, vector<1x32xf32>
    %18 = vector.broadcast %17 : vector<1x32xf32> to vector<8x32xf32>
    %19 = arith.addf %16, %18 : vector<8x32xf32>
    %cst_16 = arith.constant 0.000000e+00 : f32
    %20 = vector.broadcast %cst_16 : f32 to vector<8x32xf32>
    %21 = arith.maximumf %19, %20 : vector<8x32xf32>
    %c0_17 = arith.constant 0 : index
    %c0_18 = arith.constant 0 : index
    %22 = vector.load %arg8[%c0_17, %c0_18] : memref<8x32xf32, #tpu.memory_space<vmem>>, vector<8x32xf32>
    tpu.vector_store %arg8[%c0_17, %c0_18], %21 {strides = array<i32>} : memref<8x32xf32, #tpu.memory_space<vmem>>, vector<8x32xf32>,
    return
  }
  func.func @transform_0(%arg0: i32) -> (i32, i32) {
    %c0_i32 = arith.constant 0 : i32
    %c0_i32_0 = arith.constant 0 : i32
    return %arg0, %c0_i32 : i32, i32
  }
  func.func @transform_1(%arg0: i32) -> (i32, i32) {
    %c0_i32 = arith.constant 0 : i32
    %c0_i32_0 = arith.constant 0 : i32
    return %arg0, %c0_i32 : i32, i32
  }
  func.func @transform_2(%arg0: i32) -> (i32, i32) {
    %c0_i32 = arith.constant 0 : i32
    %c0_i32_0 = arith.constant 0 : i32
    %c0_i32_1 = arith.constant 0 : i32
    return %c0_i32, %c0_i32_0 : i32, i32
  }
  func.func @transform_3(%arg0: i32) -> (i32, i32) {
    %c0_i32 = arith.constant 0 : i32
    %c0_i32_0 = arith.constant 0 : i32
    %c0_i32_1 = arith.constant 0 : i32
    return %c0_i32, %c0_i32_0 : i32, i32
  }
  func.func @transform_4(%arg0: i32) -> (i32, i32) {
    %c0_i32 = arith.constant 0 : i32
    %c0_i32_0 = arith.constant 0 : i32
    %c0_i32_1 = arith.constant 0 : i32
    return %c0_i32, %c0_i32_0 : i32, i32
  }
  func.func @transform_5(%arg0: i32) -> (i32, i32) {
    %c0_i32 = arith.constant 0 : i32
    %c0_i32_0 = arith.constant 0 : i32
    %c0_i32_1 = arith.constant 0 : i32
    return %c0_i32, %c0_i32_0 : i32, i32
  }
  func.func @transform_6(%arg0: i32) -> (i32, i32) {
    %c0_i32 = arith.constant 0 : i32
    %c0_i32_0 = arith.constant 0 : i32
    %c0_i32_1 = arith.constant 0 : i32
    return %c0_i32, %c0_i32_0 : i32, i32
  }
  func.func @transform_7(%arg0: i32) -> (i32, i32) {
    %c0_i32 = arith.constant 0 : i32
    %c0_i32_0 = arith.constant 0 : i32
    return %arg0, %c0_i32 : i32, i32
  }
}

</mosaic_0001>

<bundles_post_ra>
// kernel: tpu_custom_call.1
= control target key start
LH: loop header
LB: loop body
LE: loop exit
PB: predicated region body
PF: predicated region fallthrough
CT: control target
= control target key end

     0   :  { %12 = vsyncpa [#allocation3], 0  ;;  %s1695_s0 = inlined_call_operand.vmem [shape: f32[8,512], index: 0, kind: input, shape index: {}]   ;;  %s1696_s1 = inlined_call_operand.vmem [shape: f32[8,768], index: 1, kind: input, shape index: {}]   ;;  %s1697_s2 = inlined_call_operand.hbm [shape: bf16[512,128], index: 2, kind: input, shape index: {}]   ;;  %s1698_s3 = inlined_call_operand.hbm [shape: bf16[768,128], index: 3, kind: input, shape index: {}]   ;;  %s1699_s4 = inlined_call_operand.vmem [shape: f32[1,256], index: 4, kind: input, shape index: {}]   ;;  %s1700_s5 = inlined_call_operand.vmem [shape: bf16[256,32], index: 5, kind: input, shape index: {}]   ;;  %s1701_s6 = inlined_call_operand.vmem [shape: f32[1,32], index: 6, kind: input, shape index: {}]   ;;  %s1702_s7 = inlined_call_operand.hbm [shape: f32[8,32], index: 7, kind: output, shape index: {}]  }
   0x1   :  { %13 = vsyncpa [#allocation6], 0 }
   0x2   :  { %14 = vsyncpa [#allocation4], 0  ;;  %s1530_s24 = smov [#allocation2]   ;;  %s1458_s28 = scalar_lea.hbm %s1697_s2, 4096 }
   0x3   :  { %s24_s25 = sshll.u32 %s1530_s24, 4  ;;  %p1459_p0 = scmp.ne.s32.totalorder %s1697_s2, %s1458_s28  ;;  %s25_s25 = int_to_ptr.vmem [resolvable:$true] %s24_s25 }
   0x4   :  { %p1462_p1 = scmp.lt.u32.totalorder %s1458_s28, %s1697_s2 }
   0x6   :  { %p1464_p2 = pnand %p1462_p1, %p1459_p0 }
   0x8   :  { %1467 = shalt.err (!%p1464_p2)
}
   0x9   :  { %s1468_s10 = scalar_lea.vmem %s25_s25, 4096  ;;  %p1473_p4 = scmp.lt.s32.totalorder %s25_s25, %s25_s25 }
   0xa   :  { %p1469_p3 = scmp.ne.s32.totalorder %s25_s25, %s1468_s10  ;;  %p1474_p5 = scmp.lt.s32.totalorder %s1468_s10, %s1468_s10 }
   0xc   :  { %p1475_p6 = por %p1474_p5, %p1473_p4 }
   0xe   :  { %p1476_p7 = pnand %p1475_p6, %p1469_p3 }
  0x10   :  { %1479 = shalt.err (!%p1476_p7)
}
  0x11   :  { %s1531_s11 = smov 64   ;;  %s1532_s12 = smov 4  }
  0x12   :  { %30 = dma.hbm_to_vmem [thread:$0]  %s1697_s2, 4096, %s25_s25, [#allocation3], %s1531_s11, %s1531_s11, %s1532_s12  }
  0x13   :  { %s1533_s15 = smov [#allocation5]   ;;  %s1480_s19 = scalar_lea.hbm %s1698_s3, 6144 }
  0x14   :  { %s36_s16 = sshll.u32 %s1533_s15, 4  ;;  %p1481_p8 = scmp.ne.s32.totalorder %s1698_s3, %s1480_s19  ;;  %s37_s16 = int_to_ptr.vmem [resolvable:$true] %s36_s16 }
  0x15   :  { %p1484_p9 = scmp.lt.u32.totalorder %s1480_s19, %s1698_s3 }
  0x17   :  { %p1486_p10 = pnand %p1484_p9, %p1481_p8 }
  0x19   :  { %1489 = shalt.err (!%p1486_p10)
}
  0x1a   :  { %s1490_s24 = scalar_lea.vmem %s37_s16, 6144  ;;  %p1495_p12 = scmp.lt.s32.totalorder %s37_s16, %s37_s16 }
  0x1b   :  { %p1491_p11 = scmp.ne.s32.totalorder %s37_s16, %s1490_s24  ;;  %p1496_p13 = scmp.lt.s32.totalorder %s1490_s24, %s1490_s24 }
  0x1d   :  { %p1497_p0 = por %p1496_p13, %p1495_p12 }
  0x1f   :  { %p1498_p1 = pnand %p1497_p0, %p1491_p11 }
  0x21   :  { %1501 = shalt.err (!%p1498_p1)
}
  0x22   :  { %42 = dma.hbm_to_vmem [thread:$0]  %s1698_s3, 6144, %s37_s16, [#allocation6], %s1531_s11, %s1531_s11, %s1532_s12  }
  0x23   :  { %1524 = dma.done.wait [#allocation3], 4096  }
  0x24   :  { %1525 = vsyncadd [#allocation3], 4294963200 }
  0x25   :  { %1526 = dma.done.wait [#allocation6], 6144  }
  0x26   :  { %1527 = vsyncadd [#allocation6], 4294961152  ;;  %v1362_v0 = vld [vmem:[#allocation2 + $0x40] sm:$0xff]   ;;  %v1366_v4 = vld [vmem:[#allocation2 + $0x48] sm:$0xff]   ;;  %vm1110_vm0 = vcmask 261120  }
  0x27   :  { %v1363_v1 = vld [vmem:[#allocation2 + $0xc0] sm:$0xff]   ;;  %1225 = vmatprep.subr.bf16.mxu0 %v1362_v0  ;;  %v1367_v5 = vld [vmem:[#allocation2 + $0xc8] sm:$0xff]   ;;  %v1370_v8 = vld [vmem:[#allocation2 + $0x50] sm:$0xff]  }
  0x28   :  { %v1364_v2 = vld [vmem:[#allocation2] sm:$0xff]   ;;  %1247 = vmatprep.subr.bf16.mxu1 %v1363_v1  ;;  %v1368_v6 = vld [vmem:[#allocation2 + $0x8] sm:$0xff]   ;;  %v1371_v9 = vld [vmem:[#allocation2 + $0xd0] sm:$0xff]  }
  0x29   :  { %v1365_v3 = vld [vmem:[#allocation2 + $0x80] sm:$0xff]   ;;  %1226 = vmatpush3.bf16.msra.mxu0 %v1364_v2  ;;  %v1369_v7 = vld [vmem:[#allocation2 + $0x88] sm:$0xff]   ;;  %v1372_v10 = vld [vmem:[#allocation2 + $0x10] sm:$0xff]  }
  0x2a   :  { %1248 = vmatpush3.bf16.msra.mxu1 %v1365_v3  ;;  %1227 = vmatprep.subr.bf16.mxu0 %v1366_v4  ;;  %v1373_v11 = vld [vmem:[#allocation2 + $0x90] sm:$0xff]   ;;  %v1374_v12 = vld [vmem:[#allocation2 + $0x58] sm:$0xff]   ;;  %v1378_v16 = vld [vmem:[#allocation2 + $0x60] sm:$0xff]  }
  0x2b   :  { %1249 = vmatprep.subr.bf16.mxu1 %v1367_v5  ;;  %v1375_v13 = vld [vmem:[#allocation2 + $0xd8] sm:$0xff]   ;;  %v1379_v17 = vld [vmem:[#allocation2 + $0xe0] sm:$0xff]   ;;  %v1382_v20 = vld [vmem:[#allocation2 + $0x68] sm:$0xff]  }
  0x2c   :  { %v1376_v14 = vld [vmem:[#allocation2 + $0x18] sm:$0xff]   ;;  %v1380_v18 = vld [vmem:[#allocation2 + $0x20] sm:$0xff]   ;;  %v1383_v21 = vld [vmem:[#allocation2 + $0xe8] sm:$0xff]  }
  0x2d   :  { %1228 = vmatpush3.bf16.msra.mxu0 %v1368_v6  ;;  %v1377_v15 = vld [vmem:[#allocation2 + $0x98] sm:$0xff]   ;;  %v1381_v19 = vld [vmem:[#allocation2 + $0xa0] sm:$0xff]   ;;  %v1384_v22 = vld [vmem:[#allocation2 + $0x28] sm:$0xff]  }
  0x2e   :  { %1250 = vmatpush3.bf16.msra.mxu1 %v1369_v7  ;;  %1229 = vmatprep.subr.bf16.mxu0 %v1370_v8  ;;  %v1385_v23 = vld [vmem:[#allocation2 + $0xa8] sm:$0xff]   ;;  %v1386_v24 = vld [vmem:[#allocation2 + $0x70] sm:$0xff]   ;;  %v1390_v28 = vld [vmem:[#allocation2 + $0x78] sm:$0xff]  }
  0x2f   :  { %1251 = vmatprep.subr.bf16.mxu1 %v1371_v9  ;;  %v1387_v25 = vld [vmem:[#allocation2 + $0xf0] sm:$0xff]   ;;  %v1391_v29 = vld [vmem:[#allocation2 + $0xf8] sm:$0xff]   ;;  %v57_v32 = vld [vmem:[%s1695_s0 + $0x8] sm:$0xff] }
  0x30   :  { %v1388_v26 = vld [vmem:[#allocation2 + $0x30] sm:$0xff]   ;;  %v1392_v30 = vld [vmem:[#allocation2 + $0x38] sm:$0xff]   ;;  %v56_v34 = vld [vmem:[%s1695_s0] sm:$0xff]  ;;  %v61_v35 = vpack.c.bf16 %v57_v32, %v57_v32 }
  0x31   :  { %1230 = vmatpush3.bf16.msra.mxu0 %v1372_v10  ;;  %v1389_v27 = vld [vmem:[#allocation2 + $0xb0] sm:$0xff]   ;;  %v1393_v31 = vld [vmem:[#allocation2 + $0xb8] sm:$0xff]   ;;  %v60_v37 = vpack.c.bf16 %v56_v34, %v56_v34  ;;  %v1394_v40 = vld [vmem:[#allocation5 + $0x40] sm:$0xff]  }
  0x32   :  { %1252 = vmatpush3.bf16.msra.mxu1 %v1373_v11  ;;  %1231 = vmatprep.subr.bf16.mxu0 %v1374_v12  ;;  %v59_v33 = vld [vmem:[%s1695_s0 + $0x18] sm:$0xff]  ;;  %v58_v38 = vld [vmem:[%s1695_s0 + $0x10] sm:$0xff]  ;;  %v1395_v41 = vld [vmem:[#allocation5 + $0xc0] sm:$0xff]  }
  0x33   :  { %1253 = vmatprep.subr.bf16.mxu1 %v1375_v13  ;;  %v63_v36 = vpack.c.bf16 %v59_v33, %v59_v33  ;;  %v62_v39 = vpack.c.bf16 %v58_v38, %v58_v38  ;;  %364 = vmatprep.mubr.bf16.mxu0 %v61_v35  ;;  %v1396_v42 = vld [vmem:[#allocation5] sm:$0xff]   ;;  %v1398_v44 = vld [vmem:[#allocation5 + $0x48] sm:$0xff]   ;;  %v1402_v48 = vld [vmem:[#allocation5 + $0x50] sm:$0xff]  }
  0x34   :  { %v1397_v43 = vld [vmem:[#allocation5 + $0x80] sm:$0xff]   ;;  %v1399_v45 = vld [vmem:[#allocation5 + $0xc8] sm:$0xff]   ;;  %v1403_v49 = vld [vmem:[#allocation5 + $0xd0] sm:$0xff]  }
  0x35   :  { %1232 = vmatpush3.bf16.msra.mxu0 %v1376_v14  ;;  %404 = vmatprep.mubr.bf16.mxu1 %v63_v36  ;;  %v1400_v46 = vld [vmem:[#allocation5 + $0x8] sm:$0xff]   ;;  %v1404_v50 = vld [vmem:[#allocation5 + $0x10] sm:$0xff]   ;;  %v1406_v52 = vld [vmem:[#allocation5 + $0x58] sm:$0xff]  }
  0x36   :  { %1254 = vmatpush3.bf16.msra.mxu1 %v1377_v15  ;;  %1233 = vmatprep.subr.bf16.mxu0 %v1378_v16  ;;  %v1401_v47 = vld [vmem:[#allocation5 + $0x88] sm:$0xff]   ;;  %v1405_v51 = vld [vmem:[#allocation5 + $0x90] sm:$0xff]   ;;  %v1407_v53 = vld [vmem:[#allocation5 + $0xd8] sm:$0xff]  }
  0x37   :  { %1255 = vmatprep.subr.bf16.mxu1 %v1379_v17  ;;  %v1408_v54 = vld [vmem:[#allocation5 + $0x18] sm:$0xff]   ;;  %v1410_v56 = vld [vmem:[#allocation5 + $0x60] sm:$0xff]   ;;  %v1414_v60 = vld [vmem:[#allocation5 + $0x68] sm:$0xff]  }
  0x38   :  { %v1409_v55 = vld [vmem:[#allocation5 + $0x98] sm:$0xff]   ;;  %v1411_v57 = vld [vmem:[#allocation5 + $0xe0] sm:$0xff]   ;;  %v1415_v61 = vld [vmem:[#allocation5 + $0xe8] sm:$0xff]  }
  0x39   :  { %1234 = vmatpush3.bf16.msra.mxu0 %v1380_v18  ;;  %v1412_v58 = vld [vmem:[#allocation5 + $0x20] sm:$0xff]   ;;  %v1416_v62 = vld [vmem:[#allocation5 + $0x28] sm:$0xff]   ;;  %v1418_v0 = vld [vmem:[#allocation5 + $0x70] sm:$0xff]  }
  0x3a   :  { %1256 = vmatpush3.bf16.msra.mxu1 %v1381_v19  ;;  %1235 = vmatprep.subr.bf16.mxu0 %v1382_v20  ;;  %v1413_v59 = vld [vmem:[#allocation5 + $0xa0] sm:$0xff]   ;;  %v1417_v63 = vld [vmem:[#allocation5 + $0xa8] sm:$0xff]   ;;  %v1419_v1 = vld [vmem:[#allocation5 + $0xf0] sm:$0xff]  }
  0x3b   :  { %1257 = vmatprep.subr.bf16.mxu1 %v1383_v21  ;;  %v1420_v2 = vld [vmem:[#allocation5 + $0x30] sm:$0xff]   ;;  %v1422_v4 = vld [vmem:[#allocation5 + $0x78] sm:$0xff]   ;;  %v65_v8 = vld [vmem:[%s1696_s1 + $0x8] sm:$0xff] }
  0x3c   :  { %v1421_v3 = vld [vmem:[#allocation5 + $0xb0] sm:$0xff]   ;;  %v1423_v5 = vld [vmem:[#allocation5 + $0xf8] sm:$0xff]   ;;  %v71_v10 = vpack.c.bf16 %v65_v8, %v65_v8  ;;  %v64_v12 = vld [vmem:[%s1696_s1] sm:$0xff] }
  0x3d   :  { %1236 = vmatpush3.bf16.msra.mxu0 %v1384_v22  ;;  %v1424_v6 = vld [vmem:[#allocation5 + $0x38] sm:$0xff]   ;;  %v66_v13 = vld [vmem:[%s1696_s1 + $0x10] sm:$0xff]  ;;  %v70_v14 = vpack.c.bf16 %v64_v12, %v64_v12  ;;  %v1426_v16 = vld [vmem:[#allocation5 + $0x140] sm:$0xff]  }
  0x3e   :  { %1258 = vmatpush3.bf16.msra.mxu1 %v1385_v23  ;;  %1237 = vmatprep.subr.bf16.mxu0 %v1386_v24  ;;  %v1425_v7 = vld [vmem:[#allocation5 + $0xb8] sm:$0xff]   ;;  %v72_v15 = vpack.c.bf16 %v66_v13, %v66_v13  ;;  %v1427_v17 = vld [vmem:[#allocation5 + $0x100] sm:$0xff]   ;;  %v1428_v18 = vld [vmem:[#allocation5 + $0x148] sm:$0xff]  }
  0x3f   :  { %1259 = vmatprep.subr.bf16.mxu1 %v1387_v25  ;;  %v67_v9 = vld [vmem:[%s1696_s1 + $0x18] sm:$0xff]  ;;  %v1429_v19 = vld [vmem:[#allocation5 + $0x108] sm:$0xff]   ;;  %v1430_v20 = vld [vmem:[#allocation5 + $0x150] sm:$0xff]  }
  0x40   :  { %v73_v11 = vpack.c.bf16 %v67_v9, %v67_v9  ;;  %v1431_v21 = vld [vmem:[#allocation5 + $0x110] sm:$0xff]   ;;  %v1432_v22 = vld [vmem:[#allocation5 + $0x158] sm:$0xff]   ;;  %v1434_v24 = vld [vmem:[#allocation5 + $0x160] sm:$0xff]  }
  0x41   :  { %1238 = vmatpush3.bf16.msra.mxu0 %v1388_v26  ;;  %v1433_v23 = vld [vmem:[#allocation5 + $0x118] sm:$0xff]   ;;  %v1435_v25 = vld [vmem:[#allocation5 + $0x120] sm:$0xff]   ;;  %v69_v26 = vld [vmem:[%s1696_s1 + $0x28] sm:$0xff] }
  0x42   :  { %1260 = vmatpush3.bf16.msra.mxu1 %v1389_v27  ;;  %1239 = vmatprep.subr.bf16.mxu0 %v1390_v28  ;;  %v1436_v27 = vld [vmem:[#allocation5 + $0x168] sm:$0xff]   ;;  %v75_v28 = vpack.c.bf16 %v69_v26, %v69_v26  ;;  %v1440_v32 = vld [vmem:[#allocation5 + $0x178] sm:$0xff]   ;;  %v68_v34 = vld [vmem:[%s1696_s1 + $0x20] sm:$0xff]  ;;  %s1534_s1 = smov [#allocation7]  }
  0x43   :  { %1261 = vmatprep.subr.bf16.mxu1 %v1391_v29  ;;  %v1437_v29 = vld [vmem:[#allocation5 + $0x128] sm:$0xff]   ;;  %v1441_v33 = vld [vmem:[#allocation5 + $0x138] sm:$0xff]   ;;  %v74_v35 = vpack.c.bf16 %v68_v34, %v68_v34  ;;  %v1442_v36 = vld [vmem:[%s1700_s5 + $0x40] sm:$0xff]   ;;  %s1118_s26 = sshll.u32 %s1534_s1, 4  ;;  %s1119_s26 = int_to_ptr.vmem [resolvable:$true] %s1118_s26 }
  0x44   :  { %v1444_v38 = vld [vmem:[%s1700_s5 + $0x48] sm:$0xff]   ;;  %v916_v13 = vld [vmem:[%s1699_s4] sm:$0x3]  ;;  %s1502_s27 = scalar_lea.vmem %s1119_s26, 128  ;;  %p1507_p3 = scmp.lt.s32.totalorder %s1119_s26, %s1119_s26 }
  0x45   :  { %1240 = vmatpush3.bf16.msra.mxu0 %v1392_v30  ;;  %v1438_v30 = vld [vmem:[#allocation5 + $0x170] sm:$0xff]   ;;  %p1503_p2 = scmp.ne.s32.totalorder %s1119_s26, %s1502_s27  ;;  %p1508_p4 = scmp.lt.s32.totalorder %s1502_s27, %s1502_s27 }
  0x46   :  { %1262 = vmatpush3.bf16.msra.mxu1 %v1393_v31  ;;  %1269 = vmatprep.subr.bf16.mxu0 %v1394_v40  ;;  %v1439_v31 = vld [vmem:[#allocation5 + $0x130] sm:$0xff]  }
  0x47   :  { %1291 = vmatprep.subr.bf16.mxu1 %v1395_v41  ;;  %v1446_v40 = vld [vmem:[%s1700_s5 + $0x50] sm:$0xff]   ;;  %p1509_p5 = por %p1508_p4, %p1507_p3 }
  0x48   :  { %365 = vmatmul.mubr.bf16.vlgmr.msra.gmra.mrb[0].mxu0 %v60_v37  ;;  %v1443_v37 = vld [vmem:[%s1700_s5] sm:$0xff]   ;;  %v1447_v41 = vld [vmem:[%s1700_s5 + $0x10] sm:$0xff]  }
  0x49   :  { %405 = vmatmul.mubr.bf16.vlgmr.msra.gmra.mrb[0].mxu1 %v62_v39  ;;  %1270 = vmatpush3.bf16.msra.mxu0 %v1396_v42  ;;  %v1445_v39 = vld [vmem:[%s1700_s5 + $0x8] sm:$0xff]   ;;  %v1448_v42 = vld [vmem:[%s1700_s5 + $0x58] sm:$0xff]   ;;  %p1510_p6 = pnand %p1509_p5, %p1503_p2 }
  0x4a   :  { %1292 = vmatpush3.bf16.msra.mxu1 %v1397_v43  ;;  %1271 = vmatprep.subr.bf16.mxu0 %v1398_v44  ;;  %v1449_v43 = vld [vmem:[%s1700_s5 + $0x18] sm:$0xff]   ;;  %v1450_v44 = vld [vmem:[%s1700_s5 + $0x60] sm:$0xff]  }
  0x4b   :  { %1293 = vmatprep.subr.bf16.mxu1 %v1399_v45  ;;  %828 = vmatprep.mubr.bf16.mxu0 %v71_v10  ;;  %v1451_v45 = vld [vmem:[%s1700_s5 + $0x20] sm:$0xff]   ;;  %v918_v10 = vlaneseq }
  0x4c   :  { %868 = vmatprep.mubr.bf16.mxu1 %v73_v11 }
  0x4d   :  { %1272 = vmatpush3.bf16.msra.mxu0 %v1400_v46  ;;  %v1452_v46 = vld [vmem:[%s1700_s5 + $0x68] sm:$0xff]   ;;  %v919_v11 = vshrl.u32 %v918_v10, 7 }
  0x4e   :  { %1294 = vmatpush3.bf16.msra.mxu1 %v1401_v47  ;;  %1273 = vmatprep.subr.bf16.mxu0 %v1402_v48  ;;  %v1453_v47 = vld [vmem:[%s1700_s5 + $0x28] sm:$0xff]   ;;  %v1454_v48 = vld [vmem:[%s1700_s5 + $0x70] sm:$0xff]  }
  0x4f   :  { %1295 = vmatprep.subr.bf16.mxu1 %v1403_v49  ;;  %v1455_v49 = vld [vmem:[%s1700_s5 + $0x30] sm:$0xff]   ;;  %v920_v12 = vsub.s32 0, %v919_v11 }
  0x51   :  { %1274 = vmatpush3.bf16.msra.mxu0 %v1404_v50  ;;  %v1456_v50 = vld [vmem:[%s1700_s5 + $0x78] sm:$0xff]  }
  0x52   :  { %1296 = vmatpush3.bf16.msra.mxu1 %v1405_v51  ;;  %1275 = vmatprep.subr.bf16.mxu0 %v1406_v52  ;;  %v1457_v51 = vld [vmem:[%s1700_s5 + $0x38] sm:$0xff]  }
  0x53   :  { %1297 = vmatprep.subr.bf16.mxu1 %v1407_v53 }
  0x55   :  { %1276 = vmatpush3.bf16.msra.mxu0 %v1408_v54 }
  0x56   :  { %1298 = vmatpush3.bf16.msra.mxu1 %v1409_v55  ;;  %1277 = vmatprep.subr.bf16.mxu0 %v1410_v56 }
  0x57   :  { %1299 = vmatprep.subr.bf16.mxu1 %v1411_v57 }
  0x59   :  { %1278 = vmatpush3.bf16.msra.mxu0 %v1412_v58 }
  0x5a   :  { %1300 = vmatpush3.bf16.msra.mxu1 %v1413_v59  ;;  %1279 = vmatprep.subr.bf16.mxu0 %v1414_v60 }
  0x5b   :  { %1301 = vmatprep.subr.bf16.mxu1 %v1415_v61 }
  0x5d   :  { %1280 = vmatpush3.bf16.msra.mxu0 %v1416_v62 }
  0x5e   :  { %1302 = vmatpush3.bf16.msra.mxu1 %v1417_v63  ;;  %1281 = vmatprep.subr.bf16.mxu0 %v1418_v0 }
  0x5f   :  { %1303 = vmatprep.subr.bf16.mxu1 %v1419_v1 }
  0x61   :  { %1282 = vmatpush3.bf16.msra.mxu0 %v1420_v2 }
  0x62   :  { %1304 = vmatpush3.bf16.msra.mxu1 %v1421_v3  ;;  %1283 = vmatprep.subr.bf16.mxu0 %v1422_v4 }
  0x63   :  { %1305 = vmatprep.subr.bf16.mxu1 %v1423_v5 }
  0x65   :  { %1284 = vmatpush3.bf16.msra.mxu0 %v1424_v6 }
  0x66   :  { %1306 = vmatpush3.bf16.msra.mxu1 %v1425_v7  ;;  %1313 = vmatprep.subr.bf16.mxu0 %v1426_v16 }
  0x67   :  { %1335 = vmatprep.subr.bf16.mxu1 %v1442_v36 }
  0x68   :  { %829 = vmatmul.mubr.bf16.vlgmr.msra.gmra.mrb[4].mxu0 %v70_v14  ;;  %v924_v14 = vsub.s32 1, %v919_v11 }
  0x69   :  { %869 = vmatmul.mubr.bf16.vlgmr.msra.gmra.mrb[4].mxu1 %v72_v15  ;;  %1314 = vmatpush3.bf16.msra.mxu0 %v1427_v17  ;;  %v921_v15 = vrot.slane %v916_v13, %v920_v12 }
  0x6a   :  { %1315 = vmatprep.subr.bf16.mxu0 %v1428_v18  ;;  %908 = vmatprep.mubr.bf16.mxu0 %v75_v28 }
  0x6b   :  { %1336 = vmatpush3.bf16.msra.mxu1 %v1443_v37 }
  0x6c   :  { %1337 = vmatprep.subr.bf16.mxu1 %v1444_v38 }
  0x6d   :  { %1316 = vmatpush3.bf16.msra.mxu0 %v1429_v19  ;;  %v925_v19 = vrot.slane %v916_v13, %v924_v14 }
  0x6e   :  { %1317 = vmatprep.subr.bf16.mxu0 %v1430_v20 }
  0x6f   :  { %1338 = vmatpush3.bf16.msra.mxu1 %v1445_v39 }
  0x70   :  { %1339 = vmatprep.subr.bf16.mxu1 %v1446_v40 }
  0x71   :  { %1318 = vmatpush3.bf16.msra.mxu0 %v1431_v21 }
  0x72   :  { %1319 = vmatprep.subr.bf16.mxu0 %v1432_v22 }
  0x73   :  { %1340 = vmatpush3.bf16.msra.mxu1 %v1447_v41 }
  0x74   :  { %1341 = vmatprep.subr.bf16.mxu1 %v1448_v42 }
  0x75   :  { %1320 = vmatpush3.bf16.msra.mxu0 %v1433_v23 }
  0x76   :  { %1321 = vmatprep.subr.bf16.mxu0 %v1434_v24 }
  0x77   :  { %1342 = vmatpush3.bf16.msra.mxu1 %v1449_v43 }
  0x78   :  { %1343 = vmatprep.subr.bf16.mxu1 %v1450_v44 }
  0x79   :  { %1322 = vmatpush3.bf16.msra.mxu0 %v1435_v25 }
  0x7a   :  { %1323 = vmatprep.subr.bf16.mxu0 %v1436_v27 }
  0x7b   :  { %1344 = vmatpush3.bf16.msra.mxu1 %v1451_v45 }
  0x7c   :  { %1345 = vmatprep.subr.bf16.mxu1 %v1452_v46 }
  0x7d   :  { %1324 = vmatpush3.bf16.msra.mxu0 %v1437_v29 }
  0x7e   :  { %1325 = vmatprep.subr.bf16.mxu0 %v1438_v30  ;;  %v1208_v30 = vld [vmem:[%s1701_s6] ss:$0 sm:$0xff] }
  0x7f   :  { %1346 = vmatpush3.bf16.msra.mxu1 %v1453_v47 }
  0x80   :  { %1347 = vmatprep.subr.bf16.mxu1 %v1454_v48 }
  0x81   :  { %1326 = vmatpush3.bf16.msra.mxu0 %v1439_v31 }
  0x82   :  { %1327 = vmatprep.subr.bf16.mxu0 %v1440_v32 }
  0x83   :  { %1348 = vmatpush3.bf16.msra.mxu1 %v1455_v49 }
  0x84   :  { %1349 = vmatprep.subr.bf16.mxu1 %v1456_v50 }
  0x85   :  { %1328 = vmatpush3.bf16.msra.mxu0 %v1441_v33 }
  0x87   :  { %1350 = vmatpush3.bf16.msra.mxu1 %v1457_v51 }
  0x88   :  { %909 = vmatmul.mubr.bf16.vlgmr.msra.gmra.mrb[8].mxu0 %v74_v35 }
 0x11b   :  { %v1241_v52 = vpop.f32.mrb[0].mxu0 }
 0x11c   :  { %v1263_v53 = vpop.f32.mrb[0].mxu1  ;;  %v1242_v54 = vpop.f32.mrb[1].mxu0 }
 0x11d   :  { %v1264_v55 = vpop.f32.mrb[1].mxu1  ;;  %v1243_v56 = vadd.f32 %v1242_v54, %v1241_v52  ;;  %v1244_v58 = vpop.f32.mrb[2].mxu0 }
 0x11e   :  { %v1265_v57 = vadd.f32 %v1264_v55, %v1263_v53  ;;  %v1266_v59 = vpop.f32.mrb[2].mxu1  ;;  %v1245_v60 = vpop.f32.mrb[3].mxu0 }
 0x11f   :  { %v1267_v61 = vpop.f32.mrb[3].mxu1 }
 0x120   :  { %v407_v62 = vadd.f32 %v1265_v57, %v1243_v56 }
 0x122   :  { %v928_v21 = vadd.f32 %v921_v15, %v407_v62 }
 0x124   :  { %v930_v25 = vmax.f32 %v928_v21, 0.0 }
 0x126   :  { %v932_v28 = vpack.c.bf16 %v930_v25, %v930_v25 }
 0x13b   :  { %v1285_v63 = vpop.f32.mrb[4].mxu0 }
 0x13c   :  { %v1307_v0 = vpop.f32.mrb[4].mxu1  ;;  %v1286_v1 = vpop.f32.mrb[5].mxu0 }
 0x13d   :  { %v1287_v2 = vadd.f32 %v1286_v1, %v1285_v63  ;;  %v1308_v3 = vpop.f32.mrb[5].mxu1  ;;  %v1288_v4 = vpop.f32.mrb[6].mxu0 }
 0x13e   :  { %v1309_v5 = vadd.f32 %v1308_v3, %v1307_v0  ;;  %v1289_v6 = vpop.f32.mrb[7].mxu0  ;;  %v1310_v7 = vpop.f32.mrb[6].mxu1 }
 0x13f   :  { %v1311_v8 = vpop.f32.mrb[7].mxu1 }
 0x140   :  { %v871_v9 = vadd.f32 %v1309_v5, %v1287_v2 }
 0x15b   :  { %v1329_v16 = vpop.f32.mrb[8].mxu0 }
 0x15c   :  { %v1330_v17 = vpop.f32.mrb[9].mxu0 }
 0x15d   :  { %v1331_v18 = vadd.f32 %v1330_v17, %v1329_v16  ;;  %v1332_v20 = vpop.f32.mrb[10].mxu0 }
 0x15e   :  { %v1333_v22 = vpop.f32.mrb[11].mxu0 }
 0x15f   :  { %v911_v23 = vadd.f32 %v1331_v18, %v871_v9 }
 0x161   :  { %v929_v24 = vadd.f32 %v925_v19, %v911_v23 }
 0x163   :  { %v931_v26 = vmax.f32 %v929_v24, 0.0 }
 0x165   :  { %v933_v27 = vpack.c.bf16 %v931_v26, %v931_v26 }
 0x167   :  { %1101 = vmatprep.mubr.bf16.mxu1 %v933_v27 }
 0x168   :  { %1102 = vmatmul.mubr.bf16.vlgmr.msra.gmra.mrb[8].mxu1 %v932_v28 }
 0x23b   :  { %v1351_v29 = vpop.f32.mrb[8].mxu1 }
 0x23c   :  { %v1352_v31 = vpop.f32.mrb[9].mxu1 }
 0x23d   :  { %v1353_v32 = vadd.f32 %v1352_v31, %v1351_v29  ;;  %v1354_v33 = vpop.f32.mrb[10].mxu1 }
 0x23e   :  { %v1355_v34 = vpop.f32.mrb[11].mxu1 }
 0x23f   :  { %v1104_v35 = vadd.f32 %v1353_v32, %v1208_v30 }
 0x241   :  { %v1109_v36 = vmax.f32 %v1104_v35, 0.0 }
 0x243   :  { %1111 = vst.msk [vmem:[#allocation7] sm:$0xff] %vm1110_vm0, %v1109_v36 }
 0x244   :  { %1513 = shalt.err (!%p1510_p6)
}
 0x245   :  { %s1514_s29 = scalar_lea.hbm %s1702_s7, 128 }
 0x246   :  { %p1515_p7 = scmp.ne.s32.totalorder %s1702_s7, %s1514_s29  ;;  %p1518_p8 = scmp.lt.u32.totalorder %s1514_s29, %s1702_s7 }
 0x248   :  { %p1520_p9 = pnand %p1518_p8, %p1515_p7 }
 0x24a   :  { %1523 = shalt.err (!%p1520_p9)
}
 0x24b   :  { %1121 = dma.vmem_to_hbm [thread:$0]  %s1119_s26, 128, %s1702_s7, [#allocation4]  }
 0x24c   :  { %1528 = dma.done.wait [#allocation4], 128  }
 0x24d   :  { %1529 = vsyncadd [#allocation4], 4294967168 }
 0x24e   :  { %1125 = vsyncpa [#allocation3], 1 }
 0x24f   :  { %1126 = vsyncpa [#allocation6], 1 }
 0x250   :  { %1127 = vsyncpa [#allocation4], 1 }

</bundles_post_ra>
